<compile_context>
chip_gen: v7x
topology: tpu7x:2x2x1
jax: 0.10.0
libtpu: 0.0.40
codegen_flags: <defaults>
</compile_context>

<pallas_src>
import math
from functools import partial

import jax
import jax.numpy as jnp
from jax.experimental import pallas as pl
from jax.experimental.pallas import tpu as pltpu


def _round_up(x, m):
    return (x + m - 1) // m * m


def _vmem_budget_bytes():
    """~75% of physical VMEM (generation-aware: ~48 MiB v7x, ~96 MiB v5e/v6e)."""
    try:
        cap = int(pltpu.get_tpu_info().vmem_capacity_bytes)
    except Exception:
        cap = 64 * 1024 * 1024          # conservative (v7x-sized) fallback
    return (cap * 3) // 4


def _split_batch_tile_for_megacore(bt, batch):
    """v7x has 2 TensorCores that shard the 'parallel' grid axis; make sure
    there are >=2 batch tiles whenever the batch is big enough."""
    if batch > 16 and _round_up(batch, bt) // bt < 2:
        bt = max(16, _round_up((batch + 1) // 2, 16))
    return bt


# --------------------------------------------------------------------------
# Path A: weights resident in VMEM, unrolled layer loop, grid = (batch_tiles,)
# --------------------------------------------------------------------------
def _make_resident_kernel(n_layers):
    def kernel(x_ref, *refs):
        # refs = (w0, b0, w1, b1, ..., w_{L-1}, b_{L-1}, o_ref)
        o_ref = refs[-1]
        h = x_ref[...]
        z = None
        for i in range(n_layers):                 # unrolled static layer loop
            w = refs[2 * i][...]
            b = refs[2 * i + 1][...]
            z = jnp.dot(h, w, preferred_element_type=jnp.float32) + b
            if i < n_layers - 1:
                h = jnp.maximum(z, 0.0).astype(x_ref.dtype)
        o_ref[...] = z.astype(o_ref.dtype)
    return kernel


def _resident_forward(xp, padded_layers, bt, out_p, vmem_limit):
    bp, in_p = xp.shape
    n_layers = len(padded_layers)

    in_specs = [pl.BlockSpec((bt, in_p), lambda b: (b, 0))]
    args = [xp]
    for wp, bvec in padded_layers:
        in_specs.append(pl.BlockSpec(memory_space=pltpu.MemorySpace.VMEM))
        in_specs.append(pl.BlockSpec(memory_space=pltpu.MemorySpace.VMEM))
        args.append(wp)
        args.append(bvec)

    return pl.pallas_call(
        _make_resident_kernel(n_layers),
        out_shape=jax.ShapeDtypeStruct((bp, out_p), jnp.float32),
        grid_spec=pltpu.PrefetchScalarGridSpec(
            num_scalar_prefetch=0,
            grid=(bp // bt,),
            in_specs=in_specs,
            out_specs=pl.BlockSpec((bt, out_p), lambda b: (b, 0)),
        ),
        compiler_params=pltpu.CompilerParams(
            dimension_semantics=("parallel",),
            vmem_limit_bytes=vmem_limit,
        ),
    )(*args)


# --------------------------------------------------------------------------
# Path B: layer-streaming fallback, grid = (batch_tiles, num_layers)
# --------------------------------------------------------------------------
def _stream_kernel(x_ref, w_ref, b_ref, o_ref, act_ref):
    layer = pl.program_id(1)
    n_layers = pl.num_programs(1)
    in_p = x_ref.shape[-1]
    out_p = o_ref.shape[-1]

    # Seed the carried activation with the (narrow) input tile at layer 0.
    @pl.when(layer == 0)
    def _():
        act_ref[...] = jnp.zeros_like(act_ref)
        act_ref[:, :in_p] = x_ref[...]

    # y = act @ W + b, accumulated in f32 on the MXU.
    y = jnp.dot(act_ref[...], w_ref[0],
                preferred_element_type=jnp.float32) + b_ref[0]

    @pl.when(layer < n_layers - 1)
    def _():
        act_ref[...] = jnp.maximum(y, 0.0).astype(act_ref.dtype)

    # Output layer: no activation; write only the lane-narrow output block.
    @pl.when(layer == n_layers - 1)
    def _():
        o_ref[...] = y[:, :out_p].astype(o_ref.dtype)


def _streaming_forward(xp, w_all, b_all, bt, out_p, w_buffers, vmem_limit):
    bp, in_p = xp.shape
    n_layers, dp, _ = w_all.shape

    w_spec_kwargs = {}
    if w_buffers > 2:
        # Hide one extra layer of weight-DMA latency when batch tiles are thin.
        w_spec_kwargs["pipeline_mode"] = pl.Buffered(w_buffers)
    w_spec = pl.BlockSpec((1, dp, dp), lambda b, l: (l, 0, 0), **w_spec_kwargs)

    return pl.pallas_call(
        _stream_kernel,
        out_shape=jax.ShapeDtypeStruct((bp, out_p), jnp.float32),
        grid_spec=pltpu.PrefetchScalarGridSpec(
            num_scalar_prefetch=0,
            grid=(bp // bt, n_layers),
            in_specs=[
                pl.BlockSpec((bt, in_p), lambda b, l: (b, 0)),      # x (narrow)
                w_spec,                                             # weights
                pl.BlockSpec((1, 1, dp), lambda b, l: (l, 0, 0)),   # biases
            ],
            out_specs=pl.BlockSpec((bt, out_p), lambda b, l: (b, 0)),
            scratch_shapes=[pltpu.VMEM((bt, dp), w_all.dtype)],
        ),
        compiler_params=pltpu.CompilerParams(
            dimension_semantics=("parallel", "arbitrary"),
            vmem_limit_bytes=vmem_limit,
        ),
    )(xp, w_all, b_all)


# --------------------------------------------------------------------------
# Wrapper
# --------------------------------------------------------------------------
@partial(jax.jit, static_argnames=("force_streaming", "param_dtype"))
def mlp_forward(x, layers, force_streaming=False, param_dtype=jnp.bfloat16):
    """Forward pass of NeuralNetwork.

    x      : (batch, input_size) float array.
    layers : list of (w, b); w is (fan_in, fan_out), b is (fan_out,).
             layers[:-1] get ReLU, layers[-1] is the output Linear.
    """
    batch, in_features = x.shape
    output_size = layers[-1][0].shape[1]
    act_bytes = jnp.dtype(param_dtype).itemsize

    in_p = _round_up(in_features, 128)
    out_p = _round_up(output_size, 128)
    k_pads = [_round_up(w.shape[0], 128) for w, _ in layers]
    n_pads = [_round_up(w.shape[1], 128) for w, _ in layers]
    max_np = max([in_p] + n_pads)

    budget = _vmem_budget_bytes()
    batch16 = _round_up(batch, 16)

    # Per-layer-padded parameter footprint (single resident copy in VMEM).
    params_bytes = sum(k * n * act_bytes + n * 4
                       for k, n in zip(k_pads, n_pads))
    use_resident = (not force_streaming) and (
        params_bytes <= min(24 << 20, budget // 2))

    if use_resident:
        # ---- weights-resident fast path ----
        per_row = (2 * in_p * act_bytes            # x double buffer
                   + 2 * out_p * 4                 # out double buffer
                   + 2 * max_np * (4 + act_bytes)) # live intermediates
        avail = max(budget - params_bytes - (4 << 20), 16 * per_row)
        bt = min(512, batch16, max(16, (avail // per_row) // 16 * 16))
        bt = _split_batch_tile_for_megacore(bt, batch)
        bp = _round_up(batch, bt)

        need = params_bytes + bt * per_row
        vmem_limit = int(min(budget,
                             max(need + max(2 << 20, need // 4), 8 << 20)))

        xp = jnp.zeros((bp, in_p), param_dtype)
        xp = xp.at[:batch, :in_features].set(x.astype(param_dtype))

        padded_layers = []
        for (w, b), kp, np_ in zip(layers, k_pads, n_pads):
            wp = jnp.pad(w.astype(param_dtype),
                         ((0, kp - w.shape[0]), (0, np_ - w.shape[1])))
            bvec = jnp.pad(b.astype(jnp.float32),
                           (0, np_ - b.shape[0])).reshape(1, np_)
            padded_layers.append((wp, bvec))

        out = _resident_forward(xp, padded_layers, bt, out_p, vmem_limit)
    else:
        # ---- layer-streaming fallback ----
        dp = max_np
        # TODO(synk): for dp >= 2048 on v7x (64 MiB VMEM) additionally tile the
        # fan_out dimension of each layer (per-step weight block <= ~8 MiB) and
        # pad K/N per layer instead of to the max feature dim.
        slab = dp * dp * act_bytes + dp * 4

        def _need(bt_, bufs):
            return (bufs * slab                    # weight(+bias) buffers
                    + 2 * bt_ * in_p * act_bytes   # x double buffer
                    + 2 * bt_ * out_p * 4          # out double buffer
                    + bt_ * dp * act_bytes         # carried activation scratch
                    + bt_ * dp * 4)                # f32 working tile

        bt = 16
        for cand in (1024, 512, 256, 128, 64, 32, 16):
            if _need(cand, 2) + (2 << 20) <= budget:
                bt = cand
                break
        bt = min(bt, batch16)
        bt = _split_batch_tile_for_megacore(bt, batch)
        bp = _round_up(batch, bt)

        # Triple-buffer the weight slab when thin batch tiles leave the
        # per-layer weight DMA exposed and the budget has room for it.
        w_buffers = 3 if (bt <= 256 and _need(bt, 3) + (2 << 20) <= budget) else 2

        need = _need(bt, w_buffers)
        vmem_limit = int(min(budget,
                             max(need + max(2 << 20, need // 4), 8 << 20)))

        xp = jnp.zeros((bp, in_p), param_dtype)
        xp = xp.at[:batch, :in_features].set(x.astype(param_dtype))

        w_all = jnp.stack([
            jnp.pad(w.astype(param_dtype),
                    ((0, dp - w.shape[0]), (0, dp - w.shape[1])))
            for w, _ in layers])
        b_all = jnp.stack([
            jnp.pad(b.astype(jnp.float32), (0, dp - b.shape[0])).reshape(1, dp)
            for _, b in layers])

        out = _streaming_forward(xp, w_all, b_all, bt, out_p, w_buffers,
                                 vmem_limit)

    return out[:batch, :output_size]


def init_params(key, input_size, hidden_size, hidden_count, output_size):
    """PyTorch-like nn.Linear init (uniform +-1/sqrt(fan_in)); weights stored
    as (fan_in, fan_out) so the kernel computes x @ W directly."""
    sizes = ([(input_size, hidden_size)]
             + [(hidden_size, hidden_size)] * hidden_count
             + [(hidden_size, output_size)])
    keys = jax.random.split(key, 2 * len(sizes))
    layers = []
    for i, (fan_in, fan_out) in enumerate(sizes):
        bound = 1.0 / math.sqrt(fan_in)
        w = jax.random.uniform(keys[2 * i], (fan_in, fan_out), jnp.float32,
                               -bound, bound)
        b = jax.random.uniform(keys[2 * i + 1], (fan_out,), jnp.float32,
                               -bound, bound)
        layers.append((w, b))
    return layers


def reference_forward(x, layers, param_dtype=jnp.bfloat16):
    """Plain-JAX reference with the same param-dtype / f32-accumulate staging."""
    h = x.astype(param_dtype)
    for i, (w, b) in enumerate(layers):
        z = jnp.dot(h, w.astype(param_dtype),
                    preferred_element_type=jnp.float32,
                    precision=jax.lax.Precision.HIGHEST) + b.astype(jnp.float32)
        if i < len(layers) - 1:
            h = jnp.maximum(z, 0.0).astype(param_dtype)
        else:
            h = z
    return h


if __name__ == "__main__":
    # Small, deterministic example shapes consistent with the module.
    batch = 8
    input_size = 16
    hidden_size = 32
    hidden_count = 2      # extra hidden layers after the first
    output_size = 4

    key = jax.random.PRNGKey(0)
    k_params, k_x = jax.random.split(key)

    layers = init_params(k_params, input_size, hidden_size, hidden_count,
                         output_size)
    x = jax.random.normal(k_x, (batch, input_size), jnp.float32)

    ref_bf16 = reference_forward(x, layers, jnp.bfloat16)

    # 1) Weights-resident fast path (default), bf16 params.
    out = jax.block_until_ready(mlp_forward(x, layers))
    assert out.shape == (batch, output_size)
    assert jnp.allclose(out, ref_bf16, atol=2e-2, rtol=2e-2), \
        "resident path mismatch vs reference"

    # 2) Layer-streaming fallback path (forced), bf16 params.
    out_s = jax.block_until_ready(mlp_forward(x, layers, force_streaming=True))
    assert jnp.allclose(out_s, ref_bf16, atol=2e-2, rtol=2e-2), \
        "streaming path mismatch vs reference"

    # 3) f32-parameter path for closer parity with the PyTorch f32 forward.
    out_f32 = jax.block_until_ready(
        mlp_forward(x, layers, param_dtype=jnp.float32))
    ref_f32 = reference_forward(x, layers, jnp.float32)
    assert jnp.allclose(out_f32, ref_f32, atol=2e-2, rtol=2e-2), \
        "f32 path mismatch vs reference"

    print("KERNEL_OK")
</pallas_src>

<mosaic_0001>
module attributes {stable_mosaic.version = 11 : i64} {
  func.func @kernel(%arg0: i32, %arg1: memref<16x128xbf16, #tpu.memory_space<vmem>>, %arg2: memref<128x128xbf16, #tpu.memory_space<vmem>>, %arg3: memref<1x128xf32, #tpu.memory_space<vmem>>, %arg4: memref<128x128xbf16, #tpu.memory_space<vmem>>, %arg5: memref<1x128xf32, #tpu.memory_space<vmem>>, %arg6: memref<128x128xbf16, #tpu.memory_space<vmem>>, %arg7: memref<1x128xf32, #tpu.memory_space<vmem>>, %arg8: memref<128x128xbf16, #tpu.memory_space<vmem>>, %arg9: memref<1x128xf32, #tpu.memory_space<vmem>>, %arg10: memref<16x128xf32, #tpu.memory_space<vmem>>) attributes {dimension_semantics = [#tpu.dimension_semantics<parallel>], iteration_bounds = array<i64: 1>, scalar_prefetch = 0 : i64, scratch_operands = 0 : i64, tpu.core_type = #tpu.core_type<tc>, window_params = [{transform_indices = @transform_0, window_bounds = array<i64: 16, 128>}, {pipeline_mode = #tpu.pipeline_mode<synchronous>, transform_indices = @transform_1, window_bounds = array<i64: 128, 128>}, {pipeline_mode = #tpu.pipeline_mode<synchronous>, transform_indices = @transform_2, window_bounds = array<i64: 1, 128>}, {pipeline_mode = #tpu.pipeline_mode<synchronous>, transform_indices = @transform_3, window_bounds = array<i64: 128, 128>}, {pipeline_mode = #tpu.pipeline_mode<synchronous>, transform_indices = @transform_4, window_bounds = array<i64: 1, 128>}, {pipeline_mode = #tpu.pipeline_mode<synchronous>, transform_indices = @transform_5, window_bounds = array<i64: 128, 128>}, {pipeline_mode = #tpu.pipeline_mode<synchronous>, transform_indices = @transform_6, window_bounds = array<i64: 1, 128>}, {pipeline_mode = #tpu.pipeline_mode<synchronous>, transform_indices = @transform_7, window_bounds = array<i64: 128, 128>}, {pipeline_mode = #tpu.pipeline_mode<synchronous>, transform_indices = @transform_8, window_bounds = array<i64: 1, 128>}, {transform_indices = @transform_9, window_bounds = array<i64: 16, 128>}]} {
    %c0 = arith.constant 0 : index
    %c0_0 = arith.constant 0 : index
    %0 = vector.load %arg1[%c0, %c0_0] : memref<16x128xbf16, #tpu.memory_space<vmem>>, vector<16x128xbf16>
    %c0_1 = arith.constant 0 : index
    %c0_2 = arith.constant 0 : index
    %1 = vector.load %arg2[%c0_1, %c0_2] : memref<128x128xbf16, #tpu.memory_space<vmem>>, vector<128x128xbf16>
    %c0_3 = arith.constant 0 : index
    %c0_4 = arith.constant 0 : index
    %2 = vector.load %arg3[%c0_3, %c0_4] : memref<1x128xf32, #tpu.memory_space<vmem>>, vector<1x128xf32>
    %cst = arith.constant dense<0.000000e+00> : vector<16x128xf32>
    %3 = tpu.matmul %0, %1, %cst {dimension_numbers = #tpu.dot_dimension_numbers<[1], [0], [0], [1], [0, 0, 1, 1], [], []>} : vector<16x128xbf16>, vector<128x128xbf16>, vector<16x128xf32> -> vector<16x128xf32>
    %4 = vector.broadcast %2 : vector<1x128xf32> to vector<16x128xf32>
    %5 = arith.addf %3, %4 : vector<16x128xf32>
    %cst_5 = arith.constant 0.000000e+00 : f32
    %6 = vector.broadcast %cst_5 : f32 to vector<16x128xf32>
    %7 = arith.maximumf %5, %6 : vector<16x128xf32>
    %8 = arith.truncf %7 : vector<16x128xf32> to vector<16x128xbf16>
    %c0_6 = arith.constant 0 : index
    %c0_7 = arith.constant 0 : index
    %9 = vector.load %arg4[%c0_6, %c0_7] : memref<128x128xbf16, #tpu.memory_space<vmem>>, vector<128x128xbf16>
    %c0_8 = arith.constant 0 : index
    %c0_9 = arith.constant 0 : index
    %10 = vector.load %arg5[%c0_8, %c0_9] : memref<1x128xf32, #tpu.memory_space<vmem>>, vector<1x128xf32>
    %cst_10 = arith.constant dense<0.000000e+00> : vector<16x128xf32>
    %11 = tpu.matmul %8, %9, %cst_10 {dimension_numbers = #tpu.dot_dimension_numbers<[1], [0], [0], [1], [0, 0, 1, 1], [], []>} : vector<16x128xbf16>, vector<128x128xbf16>, vector<16x128xf32> -> vector<16x128xf32>
    %12 = vector.broadcast %10 : vector<1x128xf32> to vector<16x128xf32>
    %13 = arith.addf %11, %12 : vector<16x128xf32>
    %cst_11 = arith.constant 0.000000e+00 : f32
    %14 = vector.broadcast %cst_11 : f32 to vector<16x128xf32>
    %15 = arith.maximumf %13, %14 : vector<16x128xf32>
    %16 = arith.truncf %15 : vector<16x128xf32> to vector<16x128xbf16>
    %c0_12 = arith.constant 0 : index
    %c0_13 = arith.constant 0 : index
    %17 = vector.load %arg6[%c0_12, %c0_13] : memref<128x128xbf16, #tpu.memory_space<vmem>>, vector<128x128xbf16>
    %c0_14 = arith.constant 0 : index
    %c0_15 = arith.constant 0 : index
    %18 = vector.load %arg7[%c0_14, %c0_15] : memref<1x128xf32, #tpu.memory_space<vmem>>, vector<1x128xf32>
    %cst_16 = arith.constant dense<0.000000e+00> : vector<16x128xf32>
    %19 = tpu.matmul %16, %17, %cst_16 {dimension_numbers = #tpu.dot_dimension_numbers<[1], [0], [0], [1], [0, 0, 1, 1], [], []>} : vector<16x128xbf16>, vector<128x128xbf16>, vector<16x128xf32> -> vector<16x128xf32>
    %20 = vector.broadcast %18 : vector<1x128xf32> to vector<16x128xf32>
    %21 = arith.addf %19, %20 : vector<16x128xf32>
    %cst_17 = arith.constant 0.000000e+00 : f32
    %22 = vector.broadcast %cst_17 : f32 to vector<16x128xf32>
    %23 = arith.maximumf %21, %22 : vector<16x128xf32>
    %24 = arith.truncf %23 : vector<16x128xf32> to vector<16x128xbf16>
    %c0_18 = arith.constant 0 : index
    %c0_19 = arith.constant 0 : index
    %25 = vector.load %arg8[%c0_18, %c0_19] : memref<128x128xbf16, #tpu.memory_space<vmem>>, vector<128x128xbf16>
    %c0_20 = arith.constant 0 : index
    %c0_21 = arith.constant 0 : index
    %26 = vector.load %arg9[%c0_20, %c0_21] : memref<1x128xf32, #tpu.memory_space<vmem>>, vector<1x128xf32>
    %cst_22 = arith.constant dense<0.000000e+00> : vector<16x128xf32>
    %27 = tpu.matmul %24, %25, %cst_22 {dimension_numbers = #tpu.dot_dimension_numbers<[1], [0], [0], [1], [0, 0, 1, 1], [], []>} : vector<16x128xbf16>, vector<128x128xbf16>, vector<16x128xf32> -> vector<16x128xf32>
    %28 = vector.broadcast %26 : vector<1x128xf32> to vector<16x128xf32>
    %29 = arith.addf %27, %28 : vector<16x128xf32>
    %c0_23 = arith.constant 0 : index
    %c0_24 = arith.constant 0 : index
    %30 = vector.load %arg10[%c0_23, %c0_24] : memref<16x128xf32, #tpu.memory_space<vmem>>, vector<16x128xf32>
    tpu.vector_store %arg10[%c0_23, %c0_24], %29 {strides = array<i32>} : memref<16x128xf32, #tpu.memory_space<vmem>>, vector<16x128xf32>,
    return
  }
  func.func @transform_0(%arg0: i32) -> (i32, i32) {
    %c0_i32 = arith.constant 0 : i32
    %c0_i32_0 = arith.constant 0 : i32
    return %arg0, %c0_i32 : i32, i32
  }
  func.func @transform_1(%arg0: i32) -> (i32, i32) {
    %c0_i32 = arith.constant 0 : i32
    %c0_i32_0 = arith.constant 0 : i32
    %c0_i32_1 = arith.constant 0 : i32
    return %c0_i32, %c0_i32_0 : i32, i32
  }
  func.func @transform_2(%arg0: i32) -> (i32, i32) {
    %c0_i32 = arith.constant 0 : i32
    %c0_i32_0 = arith.constant 0 : i32
    %c0_i32_1 = arith.constant 0 : i32
    return %c0_i32, %c0_i32_0 : i32, i32
  }
  func.func @transform_3(%arg0: i32) -> (i32, i32) {
    %c0_i32 = arith.constant 0 : i32
    %c0_i32_0 = arith.constant 0 : i32
    %c0_i32_1 = arith.constant 0 : i32
    return %c0_i32, %c0_i32_0 : i32, i32
  }
  func.func @transform_4(%arg0: i32) -> (i32, i32) {
    %c0_i32 = arith.constant 0 : i32
    %c0_i32_0 = arith.constant 0 : i32
    %c0_i32_1 = arith.constant 0 : i32
    return %c0_i32, %c0_i32_0 : i32, i32
  }
  func.func @transform_5(%arg0: i32) -> (i32, i32) {
    %c0_i32 = arith.constant 0 : i32
    %c0_i32_0 = arith.constant 0 : i32
    %c0_i32_1 = arith.constant 0 : i32
    return %c0_i32, %c0_i32_0 : i32, i32
  }
  func.func @transform_6(%arg0: i32) -> (i32, i32) {
    %c0_i32 = arith.constant 0 : i32
    %c0_i32_0 = arith.constant 0 : i32
    %c0_i32_1 = arith.constant 0 : i32
    return %c0_i32, %c0_i32_0 : i32, i32
  }
  func.func @transform_7(%arg0: i32) -> (i32, i32) {
    %c0_i32 = arith.constant 0 : i32
    %c0_i32_0 = arith.constant 0 : i32
    %c0_i32_1 = arith.constant 0 : i32
    return %c0_i32, %c0_i32_0 : i32, i32
  }
  func.func @transform_8(%arg0: i32) -> (i32, i32) {
    %c0_i32 = arith.constant 0 : i32
    %c0_i32_0 = arith.constant 0 : i32
    %c0_i32_1 = arith.constant 0 : i32
    return %c0_i32, %c0_i32_0 : i32, i32
  }
  func.func @transform_9(%arg0: i32) -> (i32, i32) {
    %c0_i32 = arith.constant 0 : i32
    %c0_i32_0 = arith.constant 0 : i32
    return %arg0, %c0_i32 : i32, i32
  }
}

</mosaic_0001>

<bundles_post_ra>
// kernel: mlp_forward.1
= control target key start
LH: loop header
LB: loop body
LE: loop exit
PB: predicated region body
PF: predicated region fallthrough
CT: control target
= control target key end

     0   :  { %v692_v0 = vmov 0.0   ;;  %vm693_vm0 = vmmov 0   ;;  %s901_s1 = inlined_call_operand.vmem [shape: bf16[128,128], index: 1, kind: input, shape index: {}]   ;;  %s902_s3 = inlined_call_operand.vmem [shape: bf16[128,128], index: 3, kind: input, shape index: {}]   ;;  %s903_s0 = inlined_call_operand.vmem [shape: bf16[16,128], index: 0, kind: input, shape index: {}]   ;;  %s904_s5 = inlined_call_operand.vmem [shape: bf16[128,128], index: 5, kind: input, shape index: {}]   ;;  %s905_s2 = inlined_call_operand.vmem [shape: f32[1,128], index: 2, kind: input, shape index: {}]   ;;  %s906_s7 = inlined_call_operand.vmem [shape: bf16[128,128], index: 7, kind: input, shape index: {}]   ;;  %s907_s4 = inlined_call_operand.vmem [shape: f32[1,128], index: 4, kind: input, shape index: {}]   ;;  %s908_s6 = inlined_call_operand.vmem [shape: f32[1,128], index: 6, kind: input, shape index: {}]   ;;  %s909_s8 = inlined_call_operand.vmem [shape: f32[1,128], index: 8, kind: input, shape index: {}]   ;;  %s910_s9 = inlined_call_operand.vmem [shape: f32[16,128], index: 9, kind: output, shape index: {}]  }
   0x1   :  { %577 = vmatprep.subr.bf16.mxu0 %v692_v0  ;;  %v659_v1 = vld [vmem:[%s901_s1] sm:$0xff]   ;;  %593 = vmatprep.mubr.msk.bf16.mxu0 %vm693_vm0, %v692_v0  ;;  %v660_v2 = vld [vmem:[%s901_s1 + $0x8] sm:$0xff]   ;;  %v661_v3 = vld [vmem:[%s901_s1 + $0x10] sm:$0xff]  }
   0x2   :  { %597 = vmatprep.subr.bf16.mxu1 %v692_v0  ;;  %613 = vmatprep.mubr.msk.bf16.mxu1 %vm693_vm0, %v692_v0  ;;  %v668_v4 = vld [vmem:[%s902_s3] sm:$0xff]   ;;  %v662_v5 = vld [vmem:[%s901_s1 + $0x18] sm:$0xff]   ;;  %v669_v6 = vld [vmem:[%s902_s3 + $0x8] sm:$0xff]  }
   0x3   :  { %578 = vmatpush3.bf16.msra.mxu0 %v659_v1  ;;  %598 = vmatpush3.bf16.msra.mxu1 %v668_v4  ;;  %v663_v7 = vld [vmem:[%s901_s1 + $0x20] sm:$0xff]   ;;  %v670_v8 = vld [vmem:[%s902_s3 + $0x10] sm:$0xff]   ;;  %v664_v9 = vld [vmem:[%s901_s1 + $0x28] sm:$0xff]  }
   0x4   :  { %579 = vmatprep.subr.bf16.mxu0 %v692_v0  ;;  %599 = vmatprep.subr.bf16.mxu1 %v692_v0  ;;  %v671_v10 = vld [vmem:[%s902_s3 + $0x18] sm:$0xff]   ;;  %v665_v11 = vld [vmem:[%s901_s1 + $0x30] sm:$0xff]   ;;  %v672_v12 = vld [vmem:[%s902_s3 + $0x20] sm:$0xff]  }
   0x5   :  { %v666_v13 = vld [vmem:[%s901_s1 + $0x38] sm:$0xff]   ;;  %v673_v14 = vld [vmem:[%s902_s3 + $0x28] sm:$0xff]   ;;  %v667_v15 = vld [vmem:[%s903_s0] sm:$0xff]  }
   0x6   :  { %v674_v16 = vld [vmem:[%s902_s3 + $0x30] sm:$0xff]   ;;  %v675_v17 = vld [vmem:[%s902_s3 + $0x38] sm:$0xff]   ;;  %v676_v18 = vld [vmem:[%s904_s5] sm:$0xff]  }
   0x7   :  { %580 = vmatpush3.bf16.msra.mxu0 %v660_v2  ;;  %600 = vmatpush3.bf16.msra.mxu1 %v669_v6  ;;  %v677_v19 = vld [vmem:[%s904_s5 + $0x8] sm:$0xff]   ;;  %v678_v20 = vld [vmem:[%s904_s5 + $0x10] sm:$0xff]   ;;  %v679_v21 = vld [vmem:[%s904_s5 + $0x18] sm:$0xff]  }
   0x8   :  { %581 = vmatprep.subr.bf16.mxu0 %v692_v0  ;;  %601 = vmatprep.subr.bf16.mxu1 %v692_v0  ;;  %v680_v22 = vld [vmem:[%s904_s5 + $0x20] sm:$0xff]   ;;  %v681_v23 = vld [vmem:[%s904_s5 + $0x28] sm:$0xff]   ;;  %v682_v34 = vld [vmem:[%s904_s5 + $0x30] sm:$0xff]  }
   0x9   :  { %v504_v24 = vld [vmem:[%s905_s2] ss:$0 sm:$0xff]  ;;  %v683_v35 = vld [vmem:[%s904_s5 + $0x38] sm:$0xff]   ;;  %v685_v37 = vld [vmem:[%s906_s7 + $0x8] sm:$0xff]  }
   0xa   :  { %v684_v36 = vld [vmem:[%s906_s7] sm:$0xff]   ;;  %v686_v38 = vld [vmem:[%s906_s7 + $0x10] sm:$0xff]   ;;  %v687_v39 = vld [vmem:[%s906_s7 + $0x18] sm:$0xff]  }
   0xb   :  { %582 = vmatpush3.bf16.msra.mxu0 %v661_v3  ;;  %602 = vmatpush3.bf16.msra.mxu1 %v670_v8  ;;  %v688_v40 = vld [vmem:[%s906_s7 + $0x20] sm:$0xff]   ;;  %v689_v41 = vld [vmem:[%s906_s7 + $0x28] sm:$0xff]   ;;  %v690_v52 = vld [vmem:[%s906_s7 + $0x30] sm:$0xff]  }
   0xc   :  { %583 = vmatprep.subr.bf16.mxu0 %v692_v0  ;;  %603 = vmatprep.subr.bf16.mxu1 %v692_v0  ;;  %v514_v42 = vld [vmem:[%s907_s4] ss:$0 sm:$0xff]  ;;  %v691_v53 = vld [vmem:[%s906_s7 + $0x38] sm:$0xff]  }
   0xd   :  { %v523_v54 = vld [vmem:[%s908_s6] ss:$0 sm:$0xff] }
   0xf   :  { %584 = vmatpush3.bf16.msra.mxu0 %v662_v5  ;;  %604 = vmatpush3.bf16.msra.mxu1 %v671_v10 }
  0x10   :  { %585 = vmatprep.subr.bf16.mxu0 %v692_v0  ;;  %605 = vmatprep.subr.bf16.mxu1 %v692_v0 }
  0x13   :  { %586 = vmatpush3.bf16.msra.mxu0 %v663_v7  ;;  %606 = vmatpush3.bf16.msra.mxu1 %v672_v12 }
  0x14   :  { %587 = vmatprep.subr.bf16.mxu0 %v692_v0  ;;  %607 = vmatprep.subr.bf16.mxu1 %v692_v0 }
  0x17   :  { %588 = vmatpush3.bf16.msra.mxu0 %v664_v9  ;;  %608 = vmatpush3.bf16.msra.mxu1 %v673_v14 }
  0x18   :  { %589 = vmatprep.subr.bf16.mxu0 %v692_v0  ;;  %609 = vmatprep.subr.bf16.mxu1 %v692_v0 }
  0x1b   :  { %590 = vmatpush3.bf16.msra.mxu0 %v665_v11  ;;  %610 = vmatpush3.bf16.msra.mxu1 %v674_v16 }
  0x1c   :  { %591 = vmatprep.subr.bf16.mxu0 %v692_v0  ;;  %611 = vmatprep.subr.bf16.mxu1 %v692_v0 }
  0x1f   :  { %592 = vmatpush3.bf16.msra.mxu0 %v666_v13  ;;  %612 = vmatpush3.bf16.msra.mxu1 %v675_v17 }
  0x20   :  { %617 = vmatprep.subr.bf16.mxu0 %v692_v0  ;;  %637 = vmatprep.subr.bf16.mxu1 %v692_v0 }
  0x22   :  { %594 = vmatmul.mubr.bf16.vlgmr.msra.gmra.mrb[0].mxu0 %v667_v15 }
  0x23   :  { %633 = vmatprep.mubr.msk.bf16.mxu0 %vm693_vm0, %v692_v0  ;;  %618 = vmatpush3.bf16.msra.mxu0 %v676_v18 }
  0x24   :  { %619 = vmatprep.subr.bf16.mxu0 %v692_v0 }
  0x27   :  { %620 = vmatpush3.bf16.msra.mxu0 %v677_v19 }
  0x28   :  { %621 = vmatprep.subr.bf16.mxu0 %v692_v0 }
  0x2b   :  { %622 = vmatpush3.bf16.msra.mxu0 %v678_v20 }
  0x2c   :  { %623 = vmatprep.subr.bf16.mxu0 %v692_v0 }
  0x2f   :  { %624 = vmatpush3.bf16.msra.mxu0 %v679_v21 }
  0x30   :  { %625 = vmatprep.subr.bf16.mxu0 %v692_v0 }
  0x33   :  { %626 = vmatpush3.bf16.msra.mxu0 %v680_v22 }
  0x34   :  { %627 = vmatprep.subr.bf16.mxu0 %v692_v0 }
  0x37   :  { %628 = vmatpush3.bf16.msra.mxu0 %v681_v23 }
  0x38   :  { %629 = vmatprep.subr.bf16.mxu0 %v692_v0 }
  0x3b   :  { %630 = vmatpush3.bf16.msra.mxu0 %v682_v34 }
  0x3c   :  { %631 = vmatprep.subr.bf16.mxu0 %v692_v0 }
  0x3f   :  { %632 = vmatpush3.bf16.msra.mxu0 %v683_v35 }
  0xf5   :  { %v146_v25 = vpop.f32.mrb[0].mxu0 }
  0xf6   :  { %v147_v26 = vadd.f32 %v504_v24, %v146_v25  ;;  %v595_v27 = vpop.f32.mrb[1].mxu0 }
  0xf7   :  { %v149_v28 = vpop.f32.mrb[2].mxu0 }
  0xf8   :  { %v150_v29 = vadd.f32 %v504_v24, %v149_v28  ;;  %v596_v30 = vpop.f32.mrb[3].mxu0  ;;  %v153_v31 = vmax.f32 %v147_v26, 0.0 }
  0xfa   :  { %v154_v32 = vmax.f32 %v150_v29, 0.0 }
  0xfc   :  { %v155_v33 = vpack.c.bf16 %v154_v32, %v153_v31 }
  0xfe   :  { %614 = vmatmul.mubr.bf16.vlgmr.msra.gmra.mrb[0].mxu1 %v155_v33 }
  0xff   :  { %653 = vmatprep.mubr.msk.bf16.mxu1 %vm693_vm0, %v692_v0  ;;  %638 = vmatpush3.bf16.msra.mxu1 %v684_v36 }
 0x100   :  { %639 = vmatprep.subr.bf16.mxu1 %v692_v0 }
 0x103   :  { %640 = vmatpush3.bf16.msra.mxu1 %v685_v37 }
 0x104   :  { %641 = vmatprep.subr.bf16.mxu1 %v692_v0 }
 0x107   :  { %642 = vmatpush3.bf16.msra.mxu1 %v686_v38 }
 0x108   :  { %643 = vmatprep.subr.bf16.mxu1 %v692_v0 }
 0x10b   :  { %644 = vmatpush3.bf16.msra.mxu1 %v687_v39 }
 0x10c   :  { %645 = vmatprep.subr.bf16.mxu1 %v692_v0 }
 0x10f   :  { %646 = vmatpush3.bf16.msra.mxu1 %v688_v40 }
 0x110   :  { %647 = vmatprep.subr.bf16.mxu1 %v692_v0 }
 0x113   :  { %648 = vmatpush3.bf16.msra.mxu1 %v689_v41 }
 0x114   :  { %649 = vmatprep.subr.bf16.mxu1 %v692_v0 }
 0x117   :  { %650 = vmatpush3.bf16.msra.mxu1 %v690_v52 }
 0x118   :  { %651 = vmatprep.subr.bf16.mxu1 %v692_v0  ;;  %v532_v0 = vld [vmem:[%s909_s8] ss:$0 sm:$0xff] }
 0x11b   :  { %652 = vmatpush3.bf16.msra.mxu1 %v691_v53 }
 0x1d1   :  { %v261_v43 = vpop.f32.mrb[0].mxu1 }
 0x1d2   :  { %v262_v44 = vadd.f32 %v514_v42, %v261_v43  ;;  %v615_v45 = vpop.f32.mrb[1].mxu1 }
 0x1d3   :  { %v264_v46 = vpop.f32.mrb[2].mxu1 }
 0x1d4   :  { %v265_v47 = vadd.f32 %v514_v42, %v264_v46  ;;  %v616_v48 = vpop.f32.mrb[3].mxu1  ;;  %v268_v49 = vmax.f32 %v262_v44, 0.0 }
 0x1d6   :  { %v269_v50 = vmax.f32 %v265_v47, 0.0 }
 0x1d8   :  { %v270_v51 = vpack.c.bf16 %v269_v50, %v268_v49 }
 0x1da   :  { %634 = vmatmul.mubr.bf16.vlgmr.msra.gmra.mrb[4].mxu0 %v270_v51 }
 0x2ad   :  { %v376_v55 = vpop.f32.mrb[4].mxu0 }
 0x2ae   :  { %v377_v56 = vadd.f32 %v523_v54, %v376_v55  ;;  %v635_v57 = vpop.f32.mrb[5].mxu0 }
 0x2af   :  { %v379_v58 = vpop.f32.mrb[6].mxu0 }
 0x2b0   :  { %v380_v59 = vadd.f32 %v523_v54, %v379_v58  ;;  %v636_v60 = vpop.f32.mrb[7].mxu0  ;;  %v383_v61 = vmax.f32 %v377_v56, 0.0 }
 0x2b2   :  { %v384_v62 = vmax.f32 %v380_v59, 0.0 }
 0x2b4   :  { %v385_v63 = vpack.c.bf16 %v384_v62, %v383_v61 }
 0x2b6   :  { %654 = vmatmul.mubr.bf16.vlgmr.msra.gmra.mrb[4].mxu1 %v385_v63 }
 0x389   :  { %v491_v1 = vpop.f32.mrb[4].mxu1 }
 0x38a   :  { %v492_v2 = vadd.f32 %v532_v0, %v491_v1  ;;  %v655_v3 = vpop.f32.mrb[5].mxu1 }
 0x38b   :  { %v494_v4 = vpop.f32.mrb[6].mxu1 }
 0x38c   :  { %498 = vst [vmem:[%s910_s9] sm:$0xff] %v492_v2  ;;  %v495_v5 = vadd.f32 %v532_v0, %v494_v4  ;;  %v656_v6 = vpop.f32.mrb[7].mxu1 }
 0x38e   :  { %499 = vst [vmem:[%s910_s9 + $0x8] sm:$0xff] %v495_v5 }

</bundles_post_ra>
